<compile_context>
chip_gen: v7x
topology: tpu7x:2x2x1
jax: 0.10.0
libtpu: 0.0.40
codegen_flags: <defaults>
</compile_context>

<pallas_src>
import jax
import jax.numpy as jnp
from jax.experimental import pallas as pl
from jax.experimental.pallas import tpu as pltpu


def _vanilla_rnn_scan_kernel(x_ref, y_ref, s0_ref, sr0_ref, w_ref, u_ref, b_ref,
                             hx_ref, hy_ref, state_scr, sr_scr):
    """One grid step = one RNN timestep. Weights are resident; state in VMEM."""
    H = w_ref.shape[0]
    t = pl.program_id(0)

    # Load the initial carry into VMEM scratch on the first step only.
    @pl.when(t == 0)
    def _():
        state_scr[...] = s0_ref[...]
        sr_scr[...] = sr0_ref[...]

    s = state_scr[...]          # [B, H]
    sr = sr_scr[...]            # [B, H]

    # s_cat @ U computed once per step (shared by h_x and h_y): two dots
    # against static sublane-aligned slices of the resident U tile.
    su = (jnp.dot(s, u_ref[:H, :], preferred_element_type=jnp.float32)
          + jnp.dot(sr, u_ref[H:, :], preferred_element_type=jnp.float32)
          + b_ref[...])                                            # [B, H] f32

    w = w_ref[...]
    hx = jnp.tanh(jnp.dot(x_ref[0], w, preferred_element_type=jnp.float32) + su)
    hy = jnp.tanh(jnp.dot(y_ref[0], w, preferred_element_type=jnp.float32) + su)

    hx_ref[0] = hx.astype(hx_ref.dtype)
    hy_ref[0] = hy.astype(hy_ref.dtype)

    # Carry for the next timestep stays entirely in VMEM (never hits HBM).
    state_scr[...] = hx
    sr_scr[...] = hy


def vanilla_rnn_scan(xs, ys, state0, state_resident0, W, U, b):
    """Run T timesteps of the vanilla grid-RNN cell in a single kernel launch.

    xs, ys: [T, B, H]; state0, state_resident0: [B, H]; W: [H, H];
    U: [2H, H]; b: [H].  Returns (h_x_seq, h_y_seq), each [T, B, H].
    """
    T, B, H = xs.shape
    assert W.shape == (H, H) and U.shape == (2 * H, H) and b.shape == (H,)
    b2d = b.reshape(1, H)   # one-time reshape per launch

    step_spec = pl.BlockSpec((1, B, H), lambda t: (t, 0, 0))          # over time
    resident = lambda shape: pl.BlockSpec(shape, lambda t: (0,) * len(shape))

    hx_seq, hy_seq = pl.pallas_call(
        _vanilla_rnn_scan_kernel,
        out_shape=(jax.ShapeDtypeStruct((T, B, H), xs.dtype),
                   jax.ShapeDtypeStruct((T, B, H), ys.dtype)),
        grid=(T,),
        in_specs=[
            step_spec,                 # x_t   (blocked over T)
            step_spec,                 # y_t   (blocked over T)
            resident((B, H)),          # initial state        (DMA'd once)
            resident((B, H)),          # initial state_resident
            resident((H, H)),          # W                    (resident in VMEM)
            resident((2 * H, H)),      # U
            resident((1, H)),          # b
        ],
        out_specs=(step_spec, step_spec),
        scratch_shapes=[pltpu.VMEM((B, H), jnp.float32),   # state carry
                        pltpu.VMEM((B, H), jnp.float32)],  # state_resident carry
        compiler_params=pltpu.CompilerParams(
            dimension_semantics=("arbitrary",)),           # sequential recurrence
    )(xs, ys, state0, state_resident0, W, U, b2d)
    return hx_seq, hy_seq


def vanilla_rnn_cell(x_t, y_t, state, state_resident, W, U, b):
    """Single-step forward of VanillaRNNCell (T=1 specialization). Returns (h_x, h_y)."""
    hx_seq, hy_seq = vanilla_rnn_scan(x_t[None], y_t[None], state, state_resident, W, U, b)
    return hx_seq[0], hy_seq[0]


def _xavier_normal(key, shape, dtype=jnp.float32):
    fan_out, fan_in = shape[0], shape[1]
    std = (2.0 / (fan_in + fan_out)) ** 0.5
    return std * jax.random.normal(key, shape, dtype)


if __name__ == "__main__":
    hidden_size = 32
    batch_size = 2
    grid_dim = 2
    seq_len = 8
    dtype = jnp.float32

    key = jax.random.PRNGKey(0)
    kW, kU, kx, ky, ks, kr, kxs, kys = jax.random.split(key, 8)

    # Parameters (deterministic xavier-normal, zero bias — mirrors __init__).
    W = _xavier_normal(kW, (hidden_size, hidden_size), dtype)
    U = _xavier_normal(kU, (hidden_size * grid_dim, hidden_size), dtype)
    b = jnp.zeros((hidden_size,), dtype)

    # Inputs / recurrent states.
    x_t = jax.random.normal(kx, (batch_size, hidden_size), dtype)
    y_t = jax.random.normal(ky, (batch_size, hidden_size), dtype)
    state = jax.random.normal(ks, (batch_size, hidden_size), dtype)
    state_resident = jax.random.normal(kr, (batch_size, hidden_size), dtype)

    # ---- single-step forward (the module's forward semantics) ----
    cell = jax.jit(vanilla_rnn_cell)
    h_x, h_y = jax.block_until_ready(
        cell(x_t, y_t, state, state_resident, W, U, b)
    )

    s_ref = jnp.concatenate([state, state_resident], axis=1)
    ref_x = jnp.tanh(x_t @ W + s_ref @ U + b)
    ref_y = jnp.tanh(y_t @ W + s_ref @ U + b)
    assert jnp.allclose(h_x, ref_x, atol=1e-5, rtol=1e-5)
    assert jnp.allclose(h_y, ref_y, atol=1e-5, rtol=1e-5)

    # ---- multi-step scan: the caller's time loop in ONE kernel launch ----
    xs = jax.random.normal(kxs, (seq_len, batch_size, hidden_size), dtype)
    ys = jax.random.normal(kys, (seq_len, batch_size, hidden_size), dtype)

    scan = jax.jit(vanilla_rnn_scan)
    hx_seq, hy_seq = jax.block_until_ready(
        scan(xs, ys, state, state_resident, W, U, b)
    )

    def ref_step(carry, xy):
        s, sr = carry
        x, y = xy
        s_cat = jnp.concatenate([s, sr], axis=1)
        hx = jnp.tanh(x @ W + s_cat @ U + b)
        hy = jnp.tanh(y @ W + s_cat @ U + b)
        return (hx, hy), (hx, hy)

    _, (ref_hx_seq, ref_hy_seq) = jax.lax.scan(
        ref_step, (state, state_resident), (xs, ys))
    assert jnp.allclose(hx_seq, ref_hx_seq, atol=1e-4, rtol=1e-4)
    assert jnp.allclose(hy_seq, ref_hy_seq, atol=1e-4, rtol=1e-4)

    print("KERNEL_OK")
</pallas_src>

<mosaic_0001>
module attributes {stable_mosaic.version = 11 : i64} {
  func.func @_vanilla_rnn_scan_kernel(%arg0: i32, %arg1: memref<1x2x32xf32, #tpu.memory_space<vmem>>, %arg2: memref<1x2x32xf32, #tpu.memory_space<vmem>>, %arg3: memref<2x32xf32, #tpu.memory_space<vmem>>, %arg4: memref<2x32xf32, #tpu.memory_space<vmem>>, %arg5: memref<32x32xf32, #tpu.memory_space<vmem>>, %arg6: memref<64x32xf32, #tpu.memory_space<vmem>>, %arg7: memref<1x32xf32, #tpu.memory_space<vmem>>, %arg8: memref<1x2x32xf32, #tpu.memory_space<vmem>>, %arg9: memref<1x2x32xf32, #tpu.memory_space<vmem>>, %arg10: memref<2x32xf32, #tpu.memory_space<vmem>>, %arg11: memref<2x32xf32, #tpu.memory_space<vmem>>) attributes {dimension_semantics = [#tpu.dimension_semantics<arbitrary>], iteration_bounds = array<i64: 1>, scalar_prefetch = 0 : i64, scratch_operands = 2 : i64, tpu.core_type = #tpu.core_type<tc>, window_params = [{transform_indices = @transform_0, window_bounds = array<i64: 1, 2, 32>}, {transform_indices = @transform_1, window_bounds = array<i64: 1, 2, 32>}, {pipeline_mode = #tpu.pipeline_mode<synchronous>, transform_indices = @transform_2, window_bounds = array<i64: 2, 32>}, {pipeline_mode = #tpu.pipeline_mode<synchronous>, transform_indices = @transform_3, window_bounds = array<i64: 2, 32>}, {pipeline_mode = #tpu.pipeline_mode<synchronous>, transform_indices = @transform_4, window_bounds = array<i64: 32, 32>}, {pipeline_mode = #tpu.pipeline_mode<synchronous>, transform_indices = @transform_5, window_bounds = array<i64: 64, 32>}, {pipeline_mode = #tpu.pipeline_mode<synchronous>, transform_indices = @transform_6, window_bounds = array<i64: 1, 32>}, {transform_indices = @transform_7, window_bounds = array<i64: 1, 2, 32>}, {transform_indices = @transform_8, window_bounds = array<i64: 1, 2, 32>}]} {
    %c0_i32 = arith.constant 0 : i32
    %0 = arith.cmpi eq, %arg0, %c0_i32 : i32
    %1 = arith.extui %0 : i1 to i32
    %c0_i32_0 = arith.constant 0 : i32
    %2 = arith.cmpi ne, %1, %c0_i32_0 : i32
    scf.if %2 {
      %c0_30 = arith.constant 0 : index
      %c0_31 = arith.constant 0 : index
      %32 = vector.load %arg3[%c0_30, %c0_31] : memref<2x32xf32, #tpu.memory_space<vmem>>, vector<2x32xf32>
      %c0_32 = arith.constant 0 : index
      %c0_33 = arith.constant 0 : index
      %33 = vector.load %arg10[%c0_32, %c0_33] : memref<2x32xf32, #tpu.memory_space<vmem>>, vector<2x32xf32>
      tpu.vector_store %arg10[%c0_32, %c0_33], %32 {strides = array<i32>} : memref<2x32xf32, #tpu.memory_space<vmem>>, vector<2x32xf32>,
      %c0_34 = arith.constant 0 : index
      %c0_35 = arith.constant 0 : index
      %34 = vector.load %arg4[%c0_34, %c0_35] : memref<2x32xf32, #tpu.memory_space<vmem>>, vector<2x32xf32>
      %c0_36 = arith.constant 0 : index
      %c0_37 = arith.constant 0 : index
      %35 = vector.load %arg11[%c0_36, %c0_37] : memref<2x32xf32, #tpu.memory_space<vmem>>, vector<2x32xf32>
      tpu.vector_store %arg11[%c0_36, %c0_37], %34 {strides = array<i32>} : memref<2x32xf32, #tpu.memory_space<vmem>>, vector<2x32xf32>,
    } else {
    }
    %c0 = arith.constant 0 : index
    %c0_1 = arith.constant 0 : index
    %3 = vector.load %arg10[%c0, %c0_1] : memref<2x32xf32, #tpu.memory_space<vmem>>, vector<2x32xf32>
    %c0_2 = arith.constant 0 : index
    %c0_3 = arith.constant 0 : index
    %4 = vector.load %arg11[%c0_2, %c0_3] : memref<2x32xf32, #tpu.memory_space<vmem>>, vector<2x32xf32>
    %c0_4 = arith.constant 0 : index
    %c0_5 = arith.constant 0 : index
    %5 = vector.load %arg6[%c0_4, %c0_5] : memref<64x32xf32, #tpu.memory_space<vmem>>, vector<32x32xf32>
    %cst = arith.constant dense<0.000000e+00> : vector<2x32xf32>
    %6 = tpu.matmul %3, %5, %cst {dimension_numbers = #tpu.dot_dimension_numbers<[1], [0], [0], [1], [0, 0, 1, 1], [], []>} : vector<2x32xf32>, vector<32x32xf32>, vector<2x32xf32> -> vector<2x32xf32>
    %c32 = arith.constant 32 : index
    %c0_6 = arith.constant 0 : index
    %7 = vector.load %arg6[%c32, %c0_6] : memref<64x32xf32, #tpu.memory_space<vmem>>, vector<32x32xf32>
    %cst_7 = arith.constant dense<0.000000e+00> : vector<2x32xf32>
    %8 = tpu.matmul %4, %7, %cst_7 {dimension_numbers = #tpu.dot_dimension_numbers<[1], [0], [0], [1], [0, 0, 1, 1], [], []>} : vector<2x32xf32>, vector<32x32xf32>, vector<2x32xf32> -> vector<2x32xf32>
    %9 = arith.addf %6, %8 : vector<2x32xf32>
    %c0_8 = arith.constant 0 : index
    %c0_9 = arith.constant 0 : index
    %10 = vector.load %arg7[%c0_8, %c0_9] : memref<1x32xf32, #tpu.memory_space<vmem>>, vector<1x32xf32>
    %11 = vector.broadcast %10 : vector<1x32xf32> to vector<2x32xf32>
    %12 = arith.addf %9, %11 : vector<2x32xf32>
    %c0_10 = arith.constant 0 : index
    %c0_11 = arith.constant 0 : index
    %13 = vector.load %arg5[%c0_10, %c0_11] : memref<32x32xf32, #tpu.memory_space<vmem>>, vector<32x32xf32>
    %c0_12 = arith.constant 0 : index
    %c0_13 = arith.constant 0 : index
    %c0_14 = arith.constant 0 : index
    %14 = vector.load %arg1[%c0_12, %c0_13, %c0_14] : memref<1x2x32xf32, #tpu.memory_space<vmem>>, vector<1x2x32xf32>
    %15 = vector.shape_cast %14 : vector<1x2x32xf32> to vector<2x32xf32>
    %cst_15 = arith.constant dense<0.000000e+00> : vector<2x32xf32>
    %16 = tpu.matmul %15, %13, %cst_15 {dimension_numbers = #tpu.dot_dimension_numbers<[1], [0], [0], [1], [0, 0, 1, 1], [], []>} : vector<2x32xf32>, vector<32x32xf32>, vector<2x32xf32> -> vector<2x32xf32>
    %17 = arith.addf %16, %12 : vector<2x32xf32>
    %18 = math.tanh %17 : vector<2x32xf32>
    %c0_16 = arith.constant 0 : index
    %c0_17 = arith.constant 0 : index
    %c0_18 = arith.constant 0 : index
    %19 = vector.load %arg2[%c0_16, %c0_17, %c0_18] : memref<1x2x32xf32, #tpu.memory_space<vmem>>, vector<1x2x32xf32>
    %20 = vector.shape_cast %19 : vector<1x2x32xf32> to vector<2x32xf32>
    %cst_19 = arith.constant dense<0.000000e+00> : vector<2x32xf32>
    %21 = tpu.matmul %20, %13, %cst_19 {dimension_numbers = #tpu.dot_dimension_numbers<[1], [0], [0], [1], [0, 0, 1, 1], [], []>} : vector<2x32xf32>, vector<32x32xf32>, vector<2x32xf32> -> vector<2x32xf32>
    %22 = arith.addf %21, %12 : vector<2x32xf32>
    %23 = math.tanh %22 : vector<2x32xf32>
    %c0_20 = arith.constant 0 : index
    %c0_21 = arith.constant 0 : index
    %c0_22 = arith.constant 0 : index
    %24 = vector.load %arg8[%c0_20, %c0_21, %c0_22] : memref<1x2x32xf32, #tpu.memory_space<vmem>>, vector<1x2x32xf32>
    %25 = vector.shape_cast %24 : vector<1x2x32xf32> to vector<2x32xf32>
    %26 = vector.shape_cast %18 : vector<2x32xf32> to vector<1x2x32xf32>
    tpu.vector_store %arg8[%c0_20, %c0_21, %c0_22], %26 {strides = array<i32>} : memref<1x2x32xf32, #tpu.memory_space<vmem>>, vector<1x2x32xf32>,
    %c0_23 = arith.constant 0 : index
    %c0_24 = arith.constant 0 : index
    %c0_25 = arith.constant 0 : index
    %27 = vector.load %arg9[%c0_23, %c0_24, %c0_25] : memref<1x2x32xf32, #tpu.memory_space<vmem>>, vector<1x2x32xf32>
    %28 = vector.shape_cast %27 : vector<1x2x32xf32> to vector<2x32xf32>
    %29 = vector.shape_cast %23 : vector<2x32xf32> to vector<1x2x32xf32>
    tpu.vector_store %arg9[%c0_23, %c0_24, %c0_25], %29 {strides = array<i32>} : memref<1x2x32xf32, #tpu.memory_space<vmem>>, vector<1x2x32xf32>,
    %c0_26 = arith.constant 0 : index
    %c0_27 = arith.constant 0 : index
    %30 = vector.load %arg10[%c0_26, %c0_27] : memref<2x32xf32, #tpu.memory_space<vmem>>, vector<2x32xf32>
    tpu.vector_store %arg10[%c0_26, %c0_27], %18 {strides = array<i32>} : memref<2x32xf32, #tpu.memory_space<vmem>>, vector<2x32xf32>,
    %c0_28 = arith.constant 0 : index
    %c0_29 = arith.constant 0 : index
    %31 = vector.load %arg11[%c0_28, %c0_29] : memref<2x32xf32, #tpu.memory_space<vmem>>, vector<2x32xf32>
    tpu.vector_store %arg11[%c0_28, %c0_29], %23 {strides = array<i32>} : memref<2x32xf32, #tpu.memory_space<vmem>>, vector<2x32xf32>,
    return
  }
  func.func @transform_0(%arg0: i32) -> (i32, i32, i32) {
    %c0_i32 = arith.constant 0 : i32
    %c0_i32_0 = arith.constant 0 : i32
    %c0_i32_1 = arith.constant 0 : i32
    return %arg0, %c0_i32, %c0_i32_0 : i32, i32, i32
  }
  func.func @transform_1(%arg0: i32) -> (i32, i32, i32) {
    %c0_i32 = arith.constant 0 : i32
    %c0_i32_0 = arith.constant 0 : i32
    %c0_i32_1 = arith.constant 0 : i32
    return %arg0, %c0_i32, %c0_i32_0 : i32, i32, i32
  }
  func.func @transform_2(%arg0: i32) -> (i32, i32) {
    %c0_i32 = arith.constant 0 : i32
    %c0_i32_0 = arith.constant 0 : i32
    %c0_i32_1 = arith.constant 0 : i32
    return %c0_i32, %c0_i32_0 : i32, i32
  }
  func.func @transform_3(%arg0: i32) -> (i32, i32) {
    %c0_i32 = arith.constant 0 : i32
    %c0_i32_0 = arith.constant 0 : i32
    %c0_i32_1 = arith.constant 0 : i32
    return %c0_i32, %c0_i32_0 : i32, i32
  }
  func.func @transform_4(%arg0: i32) -> (i32, i32) {
    %c0_i32 = arith.constant 0 : i32
    %c0_i32_0 = arith.constant 0 : i32
    %c0_i32_1 = arith.constant 0 : i32
    return %c0_i32, %c0_i32_0 : i32, i32
  }
  func.func @transform_5(%arg0: i32) -> (i32, i32) {
    %c0_i32 = arith.constant 0 : i32
    %c0_i32_0 = arith.constant 0 : i32
    %c0_i32_1 = arith.constant 0 : i32
    return %c0_i32, %c0_i32_0 : i32, i32
  }
  func.func @transform_6(%arg0: i32) -> (i32, i32) {
    %c0_i32 = arith.constant 0 : i32
    %c0_i32_0 = arith.constant 0 : i32
    %c0_i32_1 = arith.constant 0 : i32
    return %c0_i32, %c0_i32_0 : i32, i32
  }
  func.func @transform_7(%arg0: i32) -> (i32, i32, i32) {
    %c0_i32 = arith.constant 0 : i32
    %c0_i32_0 = arith.constant 0 : i32
    %c0_i32_1 = arith.constant 0 : i32
    return %arg0, %c0_i32, %c0_i32_0 : i32, i32, i32
  }
  func.func @transform_8(%arg0: i32) -> (i32, i32, i32) {
    %c0_i32 = arith.constant 0 : i32
    %c0_i32_0 = arith.constant 0 : i32
    %c0_i32_1 = arith.constant 0 : i32
    return %arg0, %c0_i32, %c0_i32_0 : i32, i32, i32
  }
}

</mosaic_0001>

<bundles_post_ra>
// kernel: vanilla_rnn_cell.1
= control target key start
LH: loop header
LB: loop body
LE: loop exit
PB: predicated region body
PF: predicated region fallthrough
CT: control target
= control target key end

     0   :  { %14 = vsyncpa [#allocation5], 0  ;;  %v541_v3 = vmov 0.0|0.0   ;;  %vm35_vm0 = vcmask 254976   ;;  %vm542_vm1 = vmmov 0   ;;  %v543_v11 = vmov 0.0   ;;  %s687_s0 = inlined_call_operand.vmem [shape: f32[1,2,32], index: 0, kind: input, shape index: {}]   ;;  %s688_s1 = inlined_call_operand.vmem [shape: f32[1,2,32], index: 1, kind: input, shape index: {}]   ;;  %s689_s2 = inlined_call_operand.vmem [shape: f32[2,32], index: 2, kind: input, shape index: {}]   ;;  %s690_s3 = inlined_call_operand.vmem [shape: f32[2,32], index: 3, kind: input, shape index: {}]   ;;  %s691_s4 = inlined_call_operand.vmem [shape: f32[32,32], index: 4, kind: input, shape index: {}]   ;;  %s692_s5 = inlined_call_operand.vmem [shape: f32[64,32], index: 5, kind: input, shape index: {}]   ;;  %s693_s6 = inlined_call_operand.vmem [shape: f32[1,32], index: 6, kind: input, shape index: {}]   ;;  %s694_s7 = inlined_call_operand.hbm [shape: f32[1,2,32], index: 7, kind: output, shape index: {0}]   ;;  %s695_s8 = inlined_call_operand.hbm [shape: f32[1,2,32], index: 8, kind: output, shape index: {1}]  }
   0x1   :  { %v45_v0 = vld [vmem:[%s692_s5 + $0x20] sm:$0xff]  ;;  %v46_v1 = vld [vmem:[%s692_s5 + $0x28] sm:$0xff]  ;;  %460 = vmatprep.subr.bf16.mxu0 %v541_v3  ;;  %466 = vmatprep.subr.bf16.mxu1 %v541_v3  ;;  %v47_v6 = vld [vmem:[%s692_s5 + $0x30] sm:$0xff] }
   0x2   :  { %v41_v2 = vld [vmem:[%s692_s5] sm:$0xff]  ;;  %v461_v4 = vpack.c.bf16 %v46_v1, %v45_v0  ;;  %v42_v5 = vld [vmem:[%s692_s5 + $0x8] sm:$0xff]  ;;  %v48_v7 = vld [vmem:[%s692_s5 + $0x38] sm:$0xff]  ;;  %424 = vmatprep.mubr.msk.f32.mxu0 %vm542_vm1, %v543_v11  ;;  %435 = vmatprep.mubr.msk.f32.mxu1 %vm542_vm1, %v543_v11 }
   0x3   :  { %v467_v8 = vpack.c.bf16 %v42_v5, %v41_v2  ;;  %v43_v9 = vld [vmem:[%s692_s5 + $0x10] sm:$0xff]  ;;  %v44_v10 = vld [vmem:[%s692_s5 + $0x18] sm:$0xff]  ;;  %v37_v12 = vld [vmem:[%s690_s3] sm:$0x3]  ;;  %v464_v13 = vpack.c.bf16 %v48_v7, %v47_v6 }
   0x4   :  { %462 = vmatpush3.bf16.msra.mxu0 %v461_v4  ;;  %38 = vst.msk [vmem:[#allocation3] sm:$0x3] %vm35_vm0, %v37_v12  ;;  %v34_v14 = vld [vmem:[%s689_s2] sm:$0x3]  ;;  %v470_v15 = vpack.c.bf16 %v44_v10, %v43_v9  ;;  %v205_v17 = vld [vmem:[%s691_s4 + $0x8] sm:$0xff] }
   0x5   :  { %468 = vmatpush3.bf16.msra.mxu1 %v467_v8  ;;  %463 = vmatprep.subr.bf16.mxu0 %v541_v3  ;;  %36 = vst.msk [vmem:[#allocation2] sm:$0x3] %vm35_vm0, %v34_v14  ;;  %v204_v16 = vld [vmem:[%s691_s4] sm:$0xff] }
   0x6   :  { %469 = vmatprep.subr.bf16.mxu1 %v541_v3 }
   0x7   :  { %15 = vsyncpa [#allocation7], 0  ;;  %vm49_vm2 = vcmask 261120   ;;  %v473_v18 = vpack.c.bf16 %v205_v17, %v204_v16  ;;  %v206_v19 = vld [vmem:[%s691_s4 + $0x10] sm:$0xff]  ;;  %v207_v20 = vld [vmem:[%s691_s4 + $0x18] sm:$0xff]  ;;  %s545_s13 = smov [#allocation6]  }
   0x8   :  { %465 = vmatpush3.bf16.msra.mxu0 %v464_v13  ;;  %v476_v23 = vpack.c.bf16 %v207_v20, %v206_v19  ;;  %v208_v24 = vld [vmem:[%s687_s0] sm:$0x3]  ;;  %s544_s0 = smov [#allocation4]   ;;  %s379_s14 = sshll.u32 %s545_s13, 4  ;;  %s652_s14 = int_to_ptr.vmem [resolvable:$true] %s379_s14 }
   0x9   :  { %471 = vmatpush3.bf16.msra.mxu1 %v470_v15  ;;  %472 = vmatprep.subr.bf16.mxu0 %v541_v3  ;;  %v283_v25 = vld [vmem:[%s688_s1] sm:$0x3]  ;;  %s369_s1 = sshll.u32 %s544_s0, 4  ;;  %s370_s1 = int_to_ptr.vmem [resolvable:$true] %s369_s1 }
   0xa   :  { %478 = vmatprep.subr.bf16.mxu1 %v541_v3  ;;  %v393_v31 = vld [vmem:[%s693_s6] ss:$0 sm:$0xff]  ;;  %s493_s6 = scalar_lea.vmem %s370_s1, 32  ;;  %p498_p1 = scmp.lt.s32.totalorder %s370_s1, %s370_s1 }
   0xb   :  { %v40_v21 = vld [vmem:[#allocation3] sm:$0x3]  ;;  %p494_p0 = scmp.ne.s32.totalorder %s370_s1, %s493_s6  ;;  %p499_p2 = scmp.lt.s32.totalorder %s493_s6, %s493_s6 }
   0xc   :  { %425 = vmatmul.mubr.msk.f32.vlgmr.msra.gmra.mrb[0].mxu0 %vm49_vm2, %v40_v21  ;;  %v39_v22 = vld [vmem:[#allocation2] sm:$0x3] }
   0xd   :  { %436 = vmatmul.mubr.msk.f32.vlgmr.msra.gmra.mrb[0].mxu1 %vm49_vm2, %v39_v22  ;;  %474 = vmatpush3.bf16.msra.mxu0 %v473_v18  ;;  %p500_p3 = por %p499_p2, %p498_p1 }
   0xe   :  { %480 = vmatpush3.bf16.msra.mxu1 %v473_v18  ;;  %475 = vmatprep.subr.bf16.mxu0 %v541_v3 }
   0xf   :  { %481 = vmatprep.subr.bf16.mxu1 %v541_v3  ;;  %446 = vmatprep.mubr.msk.f32.mxu0 %vm542_vm1, %v543_v11  ;;  %p501_p4 = pnand %p500_p3, %p494_p0 }
  0x10   :  { %457 = vmatprep.mubr.msk.f32.mxu1 %vm542_vm1, %v543_v11 }
  0x11   :  { %477 = vmatpush3.bf16.msra.mxu0 %v476_v23 }
  0x12   :  { %483 = vmatpush3.bf16.msra.mxu1 %v476_v23 }
  0x14   :  { %447 = vmatmul.mubr.msk.f32.vlgmr.msra.gmra.mrb[2].mxu0 %vm49_vm2, %v208_v24 }
  0x15   :  { %458 = vmatmul.mubr.msk.f32.vlgmr.msra.gmra.mrb[2].mxu1 %vm49_vm2, %v283_v25 }
  0xdf   :  { %v119_v26 = vpop.f32.mrb[0].mxu0 }
  0xe0   :  { %v192_v27 = vpop.f32.mrb[0].mxu1  ;;  %v426_v28 = vpop.f32.mrb[1].mxu0 }
  0xe1   :  { %v193_v29 = vadd.f32 %v192_v27, %v119_v26  ;;  %v437_v30 = vpop.f32.mrb[1].mxu1 }
  0xe3   :  { %v203_v32 = vadd.f32 %v393_v31, %v193_v29 }
  0xe7   :  { %v278_v33 = vpop.f32.mrb[2].mxu0 }
  0xe8   :  { %v279_v34 = vadd.f32 %v278_v33, %v203_v32  ;;  %v353_v35 = vpop.f32.mrb[2].mxu1  ;;  %v448_v36 = vpop.f32.mrb[3].mxu0 }
  0xe9   :  { %v354_v37 = vadd.f32 %v353_v35, %v203_v32  ;;  %v459_v38 = vpop.f32.mrb[3].mxu1 }
  0xea   :  { %489 = vtanh.f32 %v279_v34 }
  0xeb   :  { %491 = vtanh.f32 %v354_v37 }
  0xf4   :  { %v490_v39 = vpop.eup %489 }
  0xf5   :  { %v492_v40 = vpop.eup %491  ;;  %361 = vst.msk [vmem:[#allocation2] sm:$0x3] %vm35_vm0, %v490_v39  ;;  %359 = vst.msk [vmem:[#allocation4] sm:$0x3] %vm35_vm0, %v490_v39 }
  0xf6   :  { %362 = vst.msk [vmem:[#allocation3] sm:$0x3] %vm35_vm0, %v492_v40  ;;  %360 = vst.msk [vmem:[#allocation6] sm:$0x3] %vm35_vm0, %v492_v40 }
  0xf7   :  { %504 = shalt.err (!%p501_p4)
}
  0xf8   :  { %s505_s17 = scalar_lea.hbm %s694_s7, 32 }
  0xf9   :  { %p506_p5 = scmp.ne.s32.totalorder %s694_s7, %s505_s17  ;;  %p509_p6 = scmp.lt.u32.totalorder %s505_s17, %s694_s7 }
  0xfb   :  { %p511_p7 = pnand %p509_p6, %p506_p5 }
  0xfd   :  { %514 = shalt.err (!%p511_p7)
}
  0xfe   :  { %372 = dma.vmem_to_hbm [thread:$0]  %s370_s1, 32, %s694_s7, [#allocation5]  }
  0xff   :  { %s515_s24 = scalar_lea.vmem %s652_s14, 32  ;;  %p520_p9 = scmp.lt.s32.totalorder %s652_s14, %s652_s14 }
 0x100   :  { %p516_p8 = scmp.ne.s32.totalorder %s652_s14, %s515_s24  ;;  %p521_p10 = scmp.lt.s32.totalorder %s515_s24, %s515_s24 }
 0x102   :  { %p522_p11 = por %p521_p10, %p520_p9 }
 0x104   :  { %p523_p12 = pnand %p522_p11, %p516_p8 }
 0x106   :  { %526 = shalt.err (!%p523_p12)
}
 0x107   :  { %s527_s26 = scalar_lea.hbm %s695_s8, 32 }
 0x108   :  { %p528_p13 = scmp.ne.s32.totalorder %s695_s8, %s527_s26  ;;  %p531_p0 = scmp.lt.u32.totalorder %s527_s26, %s695_s8 }
 0x10a   :  { %p533_p1 = pnand %p531_p0, %p528_p13 }
 0x10c   :  { %536 = shalt.err (!%p533_p1)
}
 0x10d   :  { %382 = dma.vmem_to_hbm [thread:$0]  %s652_s14, 32, %s695_s8, [#allocation7]  }
 0x10e   :  { %537 = dma.done.wait [#allocation5], 32  }
 0x10f   :  { %538 = vsyncadd [#allocation5], 4294967264 }
 0x110   :  { %539 = dma.done.wait [#allocation7], 32  }
 0x111   :  { %540 = vsyncadd [#allocation7], 4294967264 }
 0x112   :  { %389 = vsyncpa [#allocation5], 1 }
 0x113   :  { %390 = vsyncpa [#allocation7], 1 }

</bundles_post_ra>
